<compile_context>
chip_gen: v7x
topology: tpu7x:2x2x1
jax: 0.10.0
libtpu: 0.0.40
codegen_flags: <defaults>
</compile_context>

<pallas_src>
import jax
import jax.numpy as jnp
from jax.experimental import pallas as pl
from jax.experimental.pallas import tpu as pltpu

EPS = 1e-5  # PyTorch nn.LayerNorm default eps

# Rows of the packed (16, VW) bias/gain array.
ROW_FN_G, ROW_FN_B = 0, 1
ROW_B1, ROW_L1_G, ROW_L1_B = 2, 3, 4
ROW_B2, ROW_L2_G, ROW_L2_B = 5, 6, 7
ROW_RN_G, ROW_RN_B = 8, 9
ROW_BA = 10
ROW_BGRU = 11
NUM_VEC_ROWS = 16  # padded to a sublane multiple


def _round_up(x, m):
    return ((x + m - 1) // m) * m


def actor_kernel(obs_ref, h_ref, avail_ref,
                 w1_ref, w2_ref, wgru_ref, wa_ref, vecs_ref,
                 h_out_ref, act_out_ref, logp_out_ref):
    OBS = obs_ref.shape[1]
    H = h_ref.shape[1]
    A = avail_ref.shape[1]

    def vrow(row, d):
        # (1, d) broadcast row from the packed vector table.
        return vecs_ref[row:row + 1, :d]

    def layernorm(x, g_row, b_row, d):
        # One-pass variance: mean(x) and mean(x*x) are independent reductions.
        mu = jnp.mean(x, axis=-1, keepdims=True)
        ms = jnp.mean(x * x, axis=-1, keepdims=True)
        var = ms - mu * mu
        return (x - mu) * jax.lax.rsqrt(var + EPS) * vrow(g_row, d) + vrow(b_row, d)

    # ---- MLPBase: feature LN -> fc1 (ReLU + LN) -> fc2 (ReLU + LN) ----------
    x = layernorm(obs_ref[...], ROW_FN_G, ROW_FN_B, OBS)
    x = jnp.maximum(
        jnp.dot(x, w1_ref[...], preferred_element_type=jnp.float32)
        + vrow(ROW_B1, H), 0.0)
    x = layernorm(x, ROW_L1_G, ROW_L1_B, H)
    x = jnp.maximum(
        jnp.dot(x, w2_ref[...], preferred_element_type=jnp.float32)
        + vrow(ROW_B2, H), 0.0)
    x = layernorm(x, ROW_L2_G, ROW_L2_B, H)

    # ---- RNNLayer: one GRU step, all gates in a single fused matmul ---------
    h_prev = h_ref[...]                               # mask folded in wrapper
    xh = jnp.concatenate([x, h_prev], axis=-1)        # (TB, 2H)
    gates = (jnp.dot(xh, wgru_ref[...], preferred_element_type=jnp.float32)
             + vrow(ROW_BGRU, 4 * H))                 # (TB, 4H)
    r = jax.nn.sigmoid(gates[:, 0:H])
    z = jax.nn.sigmoid(gates[:, H:2 * H])
    gin = gates[:, 2 * H:3 * H]                       # x @ Wih_n + bih_n
    ghn = gates[:, 3 * H:4 * H]                       # h @ Whh_n + bhh_n
    n = jnp.tanh(gin + r * ghn)
    h_new = (1.0 - z) * n + z * h_prev
    feat = layernorm(h_new, ROW_RN_G, ROW_RN_B, H)

    # ---- ACTLayer (Discrete): masked logits -> argmax + log-prob ------------
    logits = (jnp.dot(feat, wa_ref[...], preferred_element_type=jnp.float32)
              + vrow(ROW_BA, A))
    logits = jnp.where(avail_ref[...] > 0.0, logits, -1e10)
    m = jnp.max(logits, axis=-1, keepdims=True)
    lse = m + jnp.log(jnp.sum(jnp.exp(logits - m), axis=-1, keepdims=True))
    ids = jax.lax.broadcasted_iota(jnp.int32, logits.shape, 1)
    is_max = logits >= m
    act = jnp.min(jnp.where(is_max, ids, A), axis=-1, keepdims=True)  # first argmax
    logp = jnp.sum(jnp.where(ids == act, logits - lse, 0.0), axis=-1, keepdims=True)

    # ---- direct slice-free stores (no packed slab, no concatenate) ----------
    h_out_ref[...] = h_new
    act_out_ref[...] = act
    logp_out_ref[...] = logp


def init_params(key, obs_dim, H, A):
    ks = jax.random.split(key, 20)

    def lin(k, i, o, scale=0.1):
        return jax.random.normal(k, (i, o), jnp.float32) * scale

    def vec(k, o, scale=0.05):
        return jax.random.normal(k, (1, o), jnp.float32) * scale

    bih_r, bih_z, bih_n = vec(ks[10], H), vec(ks[11], H), vec(ks[12], H)
    bhh_r, bhh_z, bhh_n = vec(ks[13], H), vec(ks[14], H), vec(ks[15], H)

    return {
        "fn_g": jnp.ones((1, obs_dim), jnp.float32),
        "fn_b": jnp.zeros((1, obs_dim), jnp.float32),
        "w1": lin(ks[0], obs_dim, H), "b1": vec(ks[1], H),
        "l1_g": jnp.ones((1, H), jnp.float32), "l1_b": jnp.zeros((1, H), jnp.float32),
        "w2": lin(ks[2], H, H), "b2": vec(ks[3], H),
        "l2_g": jnp.ones((1, H), jnp.float32), "l2_b": jnp.zeros((1, H), jnp.float32),
        # per-gate GRU weights (packed into one (2H,4H) matrix by the wrapper)
        "wih_r": lin(ks[4], H, H), "wih_z": lin(ks[5], H, H), "wih_n": lin(ks[6], H, H),
        "whh_r": lin(ks[7], H, H), "whh_z": lin(ks[8], H, H), "whh_n": lin(ks[9], H, H),
        # folded r/z biases (exact: r,z always use bih+bhh summed)
        "b_r": bih_r + bhh_r, "b_z": bih_z + bhh_z,
        "bih_n": bih_n, "bhh_n": bhh_n,
        "rn_g": jnp.ones((1, H), jnp.float32), "rn_b": jnp.zeros((1, H), jnp.float32),
        "wa": lin(ks[16], H, A, scale=0.01), "ba": jnp.zeros((1, A), jnp.float32),
    }


def actor_forward(obs, rnn_states, masks, available_actions, params, batch_tile=1024):
    p = params
    B, obs_dim = obs.shape
    H = p["w1"].shape[1]
    A = p["wa"].shape[1]

    # ---- batch tiling: big tiles, but always >=2 grid steps when possible ---
    Bp8 = _round_up(max(B, 8), 8)
    TB = min(_round_up(batch_tile, 8), Bp8)
    if TB >= Bp8 and Bp8 >= 16:
        # Guarantee a >=2-step grid so v7x can shard the "parallel" axis
        # across both TensorCores (harmless on v5e/v6e).
        TB = _round_up((Bp8 + 1) // 2, 8)
    Bp = _round_up(Bp8, TB)
    grid = (Bp // TB,)

    # ---- fold mask into the hidden state (exact) and pad rows ---------------
    h0 = rnn_states.reshape(B, -1)[:, :H].astype(jnp.float32)    # recurrent_N = 1
    h0 = h0 * masks.astype(jnp.float32)

    def pad_rows(a, fill=0.0):
        if Bp == B:
            return a
        filler = jnp.full((Bp - B,) + a.shape[1:], fill, a.dtype)
        return jnp.concatenate([a, filler], axis=0)

    obs_p = pad_rows(obs.astype(jnp.float32))
    h_p = pad_rows(h0)
    avail_p = pad_rows(available_actions.astype(jnp.float32), fill=1.0)

    # ---- pack parameters (once per parameter set in real deployments) -------
    zeros_hh = jnp.zeros((H, H), jnp.float32)
    w_gru = jnp.concatenate([
        jnp.concatenate([p["wih_r"], p["wih_z"], p["wih_n"], zeros_hh], axis=1),
        jnp.concatenate([p["whh_r"], p["whh_z"], zeros_hh, p["whh_n"]], axis=1),
    ], axis=0)                                                    # (2H, 4H)
    b_gru = jnp.concatenate(
        [p["b_r"], p["b_z"], p["bih_n"], p["bhh_n"]], axis=1)     # (1, 4H)

    VW = _round_up(max(obs_dim, 4 * H, A), 128)
    vecs = jnp.zeros((NUM_VEC_ROWS, VW), jnp.float32)
    for row, v in [
        (ROW_FN_G, p["fn_g"]), (ROW_FN_B, p["fn_b"]),
        (ROW_B1, p["b1"]), (ROW_L1_G, p["l1_g"]), (ROW_L1_B, p["l1_b"]),
        (ROW_B2, p["b2"]), (ROW_L2_G, p["l2_g"]), (ROW_L2_B, p["l2_b"]),
        (ROW_RN_G, p["rn_g"]), (ROW_RN_B, p["rn_b"]),
        (ROW_BA, p["ba"]), (ROW_BGRU, b_gru),
    ]:
        v = v.reshape(-1)
        vecs = vecs.at[row, :v.shape[0]].set(v)

    # ---- specs ---------------------------------------------------------------
    def batch_spec(d):
        return pl.BlockSpec((TB, d), lambda i: (i, 0))

    def full_spec(shape):
        # constant block index -> weight stays resident, no re-DMA per grid step
        return pl.BlockSpec(shape, lambda i, _n=len(shape): (0,) * _n)

    in_specs = [
        batch_spec(obs_dim), batch_spec(H), batch_spec(A),
        full_spec(p["w1"].shape), full_spec(p["w2"].shape),
        full_spec(w_gru.shape), full_spec(p["wa"].shape),
        full_spec(vecs.shape),
    ]
    out_specs = (batch_spec(H), batch_spec(1), batch_spec(1))
    out_shape = (jax.ShapeDtypeStruct((Bp, H), jnp.float32),
                 jax.ShapeDtypeStruct((Bp, 1), jnp.int32),
                 jax.ShapeDtypeStruct((Bp, 1), jnp.float32))

    h_new, actions, logp = pl.pallas_call(
        actor_kernel,
        grid=grid,
        in_specs=in_specs,
        out_specs=out_specs,
        out_shape=out_shape,
        compiler_params=pltpu.CompilerParams(
            dimension_semantics=("parallel",),
            # plenty for TB<=2048, H<=256 working sets; bump for larger tiles
            vmem_limit_bytes=32 * 1024 * 1024,
        ),
    )(obs_p, h_p, avail_p, p["w1"], p["w2"], w_gru, p["wa"], vecs)

    return (actions[:B], logp[:B], h_new[:B].reshape(B, 1, H))


def actor_reference(obs, rnn_states, masks, available_actions, params):
    """Pure-JAX reference with identical semantics (for correctness check)."""
    p = params
    B = obs.shape[0]
    H = p["w1"].shape[1]

    def ln(x, g, b):
        mu = jnp.mean(x, -1, keepdims=True)
        var = jnp.mean(jnp.square(x - mu), -1, keepdims=True)
        return (x - mu) / jnp.sqrt(var + EPS) * g + b

    x = ln(obs, p["fn_g"], p["fn_b"])
    x = jnp.maximum(x @ p["w1"] + p["b1"], 0.0)
    x = ln(x, p["l1_g"], p["l1_b"])
    x = jnp.maximum(x @ p["w2"] + p["b2"], 0.0)
    x = ln(x, p["l2_g"], p["l2_b"])

    h = rnn_states.reshape(B, H) * masks
    r = jax.nn.sigmoid(x @ p["wih_r"] + h @ p["whh_r"] + p["b_r"])
    z = jax.nn.sigmoid(x @ p["wih_z"] + h @ p["whh_z"] + p["b_z"])
    n = jnp.tanh(x @ p["wih_n"] + p["bih_n"] + r * (h @ p["whh_n"] + p["bhh_n"]))
    h_new = (1.0 - z) * n + z * h
    feat = ln(h_new, p["rn_g"], p["rn_b"])

    logits = feat @ p["wa"] + p["ba"]
    logits = jnp.where(available_actions > 0.0, logits, -1e10)
    logp_all = jax.nn.log_softmax(logits, axis=-1)
    act = jnp.argmax(logits, axis=-1, keepdims=True)
    logp = jnp.take_along_axis(logp_all, act, axis=-1)
    return act.astype(jnp.int32), logp, h_new.reshape(B, 1, H)


if __name__ == "__main__":
    B, OBS, H, A = 32, 16, 32, 6          # batch, obs_dim, hidden_size, n_actions
    key = jax.random.PRNGKey(0)
    k_obs, k_h, k_m, k_p = jax.random.split(key, 4)

    obs = jax.random.normal(k_obs, (B, OBS), jnp.float32)
    rnn_states = jax.random.normal(k_h, (B, 1, H), jnp.float32)   # (B, recurrent_N, H)
    masks = (jax.random.uniform(k_m, (B, 1)) > 0.2).astype(jnp.float32)
    available_actions = jnp.ones((B, A), jnp.float32)

    params = init_params(k_p, OBS, H, A)

    # default batch_tile; the >=2-step guarantee gives grid=(2,) here, so the
    # pipelined / parallel path is still exercised.
    actions, action_log_probs, new_rnn_states = actor_forward(
        obs, rnn_states, masks, available_actions, params)
    jax.block_until_ready((actions, action_log_probs, new_rnn_states))

    ref_a, ref_lp, ref_h = actor_reference(
        obs, rnn_states, masks, available_actions, params)

    assert actions.shape == (B, 1) and actions.dtype == jnp.int32
    assert action_log_probs.shape == (B, 1)
    assert new_rnn_states.shape == (B, 1, H)
    assert bool(jnp.all(actions == ref_a))
    assert bool(jnp.allclose(action_log_probs, ref_lp, atol=2e-3, rtol=2e-3))
    assert bool(jnp.allclose(new_rnn_states, ref_h, atol=2e-3, rtol=2e-3))
    print("KERNEL_OK")
</pallas_src>

<mosaic_0001>
module attributes {stable_mosaic.version = 11 : i64} {
  func.func @actor_kernel(%arg0: i32, %arg1: memref<16x16xf32, #tpu.memory_space<vmem>>, %arg2: memref<16x32xf32, #tpu.memory_space<vmem>>, %arg3: memref<16x6xf32, #tpu.memory_space<vmem>>, %arg4: memref<16x32xf32, #tpu.memory_space<vmem>>, %arg5: memref<32x32xf32, #tpu.memory_space<vmem>>, %arg6: memref<64x128xf32, #tpu.memory_space<vmem>>, %arg7: memref<32x6xf32, #tpu.memory_space<vmem>>, %arg8: memref<16x128xf32, #tpu.memory_space<vmem>>, %arg9: memref<16x32xf32, #tpu.memory_space<vmem>>, %arg10: memref<16x1xi32, #tpu.memory_space<vmem>>, %arg11: memref<16x1xf32, #tpu.memory_space<vmem>>) attributes {dimension_semantics = [#tpu.dimension_semantics<parallel>], iteration_bounds = array<i64: 2>, scalar_prefetch = 0 : i64, scratch_operands = 0 : i64, tpu.core_type = #tpu.core_type<tc>, window_params = [{transform_indices = @transform_0, window_bounds = array<i64: 16, 16>}, {transform_indices = @transform_1, window_bounds = array<i64: 16, 32>}, {transform_indices = @transform_2, window_bounds = array<i64: 16, 6>}, {pipeline_mode = #tpu.pipeline_mode<synchronous>, transform_indices = @transform_3, window_bounds = array<i64: 16, 32>}, {pipeline_mode = #tpu.pipeline_mode<synchronous>, transform_indices = @transform_4, window_bounds = array<i64: 32, 32>}, {pipeline_mode = #tpu.pipeline_mode<synchronous>, transform_indices = @transform_5, window_bounds = array<i64: 64, 128>}, {pipeline_mode = #tpu.pipeline_mode<synchronous>, transform_indices = @transform_6, window_bounds = array<i64: 32, 6>}, {pipeline_mode = #tpu.pipeline_mode<synchronous>, transform_indices = @transform_7, window_bounds = array<i64: 16, 128>}, {transform_indices = @transform_8, window_bounds = array<i64: 16, 32>}, {transform_indices = @transform_9, window_bounds = array<i64: 16, 1>}, {transform_indices = @transform_10, window_bounds = array<i64: 16, 1>}]} {
    %c0 = arith.constant 0 : index
    %c0_0 = arith.constant 0 : index
    %0 = vector.load %arg1[%c0, %c0_0] : memref<16x16xf32, #tpu.memory_space<vmem>>, vector<16x16xf32>
    %cst = arith.constant dense<0.000000e+00> : vector<16xf32>
    %1 = vector.multi_reduction <add>, %0, %cst [1] : vector<16x16xf32> to vector<16xf32>
    %2 = vector.shape_cast %1 : vector<16xf32> to vector<16x1xf32>
    %cst_1 = arith.constant 1.600000e+01 : f32
    %3 = vector.broadcast %cst_1 : f32 to vector<16x1xf32>
    %4 = arith.divf %2, %3 : vector<16x1xf32>
    %5 = arith.mulf %0, %0 : vector<16x16xf32>
    %cst_2 = arith.constant dense<0.000000e+00> : vector<16xf32>
    %6 = vector.multi_reduction <add>, %5, %cst_2 [1] : vector<16x16xf32> to vector<16xf32>
    %7 = vector.shape_cast %6 : vector<16xf32> to vector<16x1xf32>
    %cst_3 = arith.constant 1.600000e+01 : f32
    %8 = vector.broadcast %cst_3 : f32 to vector<16x1xf32>
    %9 = arith.divf %7, %8 : vector<16x1xf32>
    %10 = arith.mulf %4, %4 : vector<16x1xf32>
    %11 = arith.subf %9, %10 : vector<16x1xf32>
    %12 = vector.broadcast %4 : vector<16x1xf32> to vector<16x16xf32>
    %13 = arith.subf %0, %12 : vector<16x16xf32>
    %cst_4 = arith.constant 9.99999974E-6 : f32
    %14 = vector.broadcast %cst_4 : f32 to vector<16x1xf32>
    %15 = arith.addf %11, %14 : vector<16x1xf32>
    %16 = math.rsqrt %15 : vector<16x1xf32>
    %17 = vector.broadcast %16 : vector<16x1xf32> to vector<16x16xf32>
    %18 = arith.mulf %13, %17 : vector<16x16xf32>
    %c0_5 = arith.constant 0 : index
    %c0_6 = arith.constant 0 : index
    %19 = vector.load %arg8[%c0_5, %c0_6] : memref<16x128xf32, #tpu.memory_space<vmem>>, vector<1x16xf32>
    %20 = vector.broadcast %19 : vector<1x16xf32> to vector<16x16xf32>
    %21 = arith.mulf %18, %20 : vector<16x16xf32>
    %c1 = arith.constant 1 : index
    %c0_7 = arith.constant 0 : index
    %22 = vector.load %arg8[%c1, %c0_7] : memref<16x128xf32, #tpu.memory_space<vmem>>, vector<1x16xf32>
    %23 = vector.broadcast %22 : vector<1x16xf32> to vector<16x16xf32>
    %24 = arith.addf %21, %23 : vector<16x16xf32>
    %c0_8 = arith.constant 0 : index
    %c0_9 = arith.constant 0 : index
    %25 = vector.load %arg4[%c0_8, %c0_9] : memref<16x32xf32, #tpu.memory_space<vmem>>, vector<16x32xf32>
    %cst_10 = arith.constant dense<0.000000e+00> : vector<16x32xf32>
    %26 = tpu.matmul %24, %25, %cst_10 {dimension_numbers = #tpu.dot_dimension_numbers<[1], [0], [0], [1], [0, 0, 1, 1], [], []>} : vector<16x16xf32>, vector<16x32xf32>, vector<16x32xf32> -> vector<16x32xf32>
    %c2 = arith.constant 2 : index
    %c0_11 = arith.constant 0 : index
    %27 = vector.load %arg8[%c2, %c0_11] : memref<16x128xf32, #tpu.memory_space<vmem>>, vector<1x32xf32>
    %28 = vector.broadcast %27 : vector<1x32xf32> to vector<16x32xf32>
    %29 = arith.addf %26, %28 : vector<16x32xf32>
    %cst_12 = arith.constant 0.000000e+00 : f32
    %30 = vector.broadcast %cst_12 : f32 to vector<16x32xf32>
    %31 = arith.maximumf %29, %30 : vector<16x32xf32>
    %cst_13 = arith.constant dense<0.000000e+00> : vector<16xf32>
    %32 = vector.multi_reduction <add>, %31, %cst_13 [1] : vector<16x32xf32> to vector<16xf32>
    %33 = vector.shape_cast %32 : vector<16xf32> to vector<16x1xf32>
    %cst_14 = arith.constant 3.200000e+01 : f32
    %34 = vector.broadcast %cst_14 : f32 to vector<16x1xf32>
    %35 = arith.divf %33, %34 : vector<16x1xf32>
    %36 = arith.mulf %31, %31 : vector<16x32xf32>
    %cst_15 = arith.constant dense<0.000000e+00> : vector<16xf32>
    %37 = vector.multi_reduction <add>, %36, %cst_15 [1] : vector<16x32xf32> to vector<16xf32>
    %38 = vector.shape_cast %37 : vector<16xf32> to vector<16x1xf32>
    %cst_16 = arith.constant 3.200000e+01 : f32
    %39 = vector.broadcast %cst_16 : f32 to vector<16x1xf32>
    %40 = arith.divf %38, %39 : vector<16x1xf32>
    %41 = arith.mulf %35, %35 : vector<16x1xf32>
    %42 = arith.subf %40, %41 : vector<16x1xf32>
    %43 = vector.broadcast %35 : vector<16x1xf32> to vector<16x32xf32>
    %44 = arith.subf %31, %43 : vector<16x32xf32>
    %cst_17 = arith.constant 9.99999974E-6 : f32
    %45 = vector.broadcast %cst_17 : f32 to vector<16x1xf32>
    %46 = arith.addf %42, %45 : vector<16x1xf32>
    %47 = math.rsqrt %46 : vector<16x1xf32>
    %48 = vector.broadcast %47 : vector<16x1xf32> to vector<16x32xf32>
    %49 = arith.mulf %44, %48 : vector<16x32xf32>
    %c3 = arith.constant 3 : index
    %c0_18 = arith.constant 0 : index
    %50 = vector.load %arg8[%c3, %c0_18] : memref<16x128xf32, #tpu.memory_space<vmem>>, vector<1x32xf32>
    %51 = vector.broadcast %50 : vector<1x32xf32> to vector<16x32xf32>
    %52 = arith.mulf %49, %51 : vector<16x32xf32>
    %c4 = arith.constant 4 : index
    %c0_19 = arith.constant 0 : index
    %53 = vector.load %arg8[%c4, %c0_19] : memref<16x128xf32, #tpu.memory_space<vmem>>, vector<1x32xf32>
    %54 = vector.broadcast %53 : vector<1x32xf32> to vector<16x32xf32>
    %55 = arith.addf %52, %54 : vector<16x32xf32>
    %c0_20 = arith.constant 0 : index
    %c0_21 = arith.constant 0 : index
    %56 = vector.load %arg5[%c0_20, %c0_21] : memref<32x32xf32, #tpu.memory_space<vmem>>, vector<32x32xf32>
    %cst_22 = arith.constant dense<0.000000e+00> : vector<16x32xf32>
    %57 = tpu.matmul %55, %56, %cst_22 {dimension_numbers = #tpu.dot_dimension_numbers<[1], [0], [0], [1], [0, 0, 1, 1], [], []>} : vector<16x32xf32>, vector<32x32xf32>, vector<16x32xf32> -> vector<16x32xf32>
    %c5 = arith.constant 5 : index
    %c0_23 = arith.constant 0 : index
    %58 = vector.load %arg8[%c5, %c0_23] : memref<16x128xf32, #tpu.memory_space<vmem>>, vector<1x32xf32>
    %59 = vector.broadcast %58 : vector<1x32xf32> to vector<16x32xf32>
    %60 = arith.addf %57, %59 : vector<16x32xf32>
    %cst_24 = arith.constant 0.000000e+00 : f32
    %61 = vector.broadcast %cst_24 : f32 to vector<16x32xf32>
    %62 = arith.maximumf %60, %61 : vector<16x32xf32>
    %cst_25 = arith.constant dense<0.000000e+00> : vector<16xf32>
    %63 = vector.multi_reduction <add>, %62, %cst_25 [1] : vector<16x32xf32> to vector<16xf32>
    %64 = vector.shape_cast %63 : vector<16xf32> to vector<16x1xf32>
    %cst_26 = arith.constant 3.200000e+01 : f32
    %65 = vector.broadcast %cst_26 : f32 to vector<16x1xf32>
    %66 = arith.divf %64, %65 : vector<16x1xf32>
    %67 = arith.mulf %62, %62 : vector<16x32xf32>
    %cst_27 = arith.constant dense<0.000000e+00> : vector<16xf32>
    %68 = vector.multi_reduction <add>, %67, %cst_27 [1] : vector<16x32xf32> to vector<16xf32>
    %69 = vector.shape_cast %68 : vector<16xf32> to vector<16x1xf32>
    %cst_28 = arith.constant 3.200000e+01 : f32
    %70 = vector.broadcast %cst_28 : f32 to vector<16x1xf32>
    %71 = arith.divf %69, %70 : vector<16x1xf32>
    %72 = arith.mulf %66, %66 : vector<16x1xf32>
    %73 = arith.subf %71, %72 : vector<16x1xf32>
    %74 = vector.broadcast %66 : vector<16x1xf32> to vector<16x32xf32>
    %75 = arith.subf %62, %74 : vector<16x32xf32>
    %cst_29 = arith.constant 9.99999974E-6 : f32
    %76 = vector.broadcast %cst_29 : f32 to vector<16x1xf32>
    %77 = arith.addf %73, %76 : vector<16x1xf32>
    %78 = math.rsqrt %77 : vector<16x1xf32>
    %79 = vector.broadcast %78 : vector<16x1xf32> to vector<16x32xf32>
    %80 = arith.mulf %75, %79 : vector<16x32xf32>
    %c6 = arith.constant 6 : index
    %c0_30 = arith.constant 0 : index
    %81 = vector.load %arg8[%c6, %c0_30] : memref<16x128xf32, #tpu.memory_space<vmem>>, vector<1x32xf32>
    %82 = vector.broadcast %81 : vector<1x32xf32> to vector<16x32xf32>
    %83 = arith.mulf %80, %82 : vector<16x32xf32>
    %c7 = arith.constant 7 : index
    %c0_31 = arith.constant 0 : index
    %84 = vector.load %arg8[%c7, %c0_31] : memref<16x128xf32, #tpu.memory_space<vmem>>, vector<1x32xf32>
    %85 = vector.broadcast %84 : vector<1x32xf32> to vector<16x32xf32>
    %86 = arith.addf %83, %85 : vector<16x32xf32>
    %c0_32 = arith.constant 0 : index
    %c0_33 = arith.constant 0 : index
    %87 = vector.load %arg2[%c0_32, %c0_33] : memref<16x32xf32, #tpu.memory_space<vmem>>, vector<16x32xf32>
    %88 = tpu.concatenate %86, %87 in 1 : vector<16x32xf32>, vector<16x32xf32> -> vector<16x64xf32>
    %c0_34 = arith.constant 0 : index
    %c0_35 = arith.constant 0 : index
    %89 = vector.load %arg6[%c0_34, %c0_35] : memref<64x128xf32, #tpu.memory_space<vmem>>, vector<64x128xf32>
    %cst_36 = arith.constant dense<0.000000e+00> : vector<16x128xf32>
    %90 = tpu.matmul %88, %89, %cst_36 {dimension_numbers = #tpu.dot_dimension_numbers<[1], [0], [0], [1], [0, 0, 1, 1], [], []>} : vector<16x64xf32>, vector<64x128xf32>, vector<16x128xf32> -> vector<16x128xf32>
    %c11 = arith.constant 11 : index
    %c0_37 = arith.constant 0 : index
    %91 = vector.load %arg8[%c11, %c0_37] : memref<16x128xf32, #tpu.memory_space<vmem>>, vector<1x128xf32>
    %92 = vector.broadcast %91 : vector<1x128xf32> to vector<16x128xf32>
    %93 = arith.addf %90, %92 : vector<16x128xf32>
    %94 = vector.extract_strided_slice %93 {offsets = [0, 0], sizes = [16, 32], strides = [1, 1]} : vector<16x128xf32> to vector<16x32xf32>
    %95 = arith.negf %94 : vector<16x32xf32>
    %96 = math.exp %95 : vector<16x32xf32>
    %cst_38 = arith.constant 1.000000e+00 : f32
    %97 = vector.broadcast %cst_38 : f32 to vector<16x32xf32>
    %98 = arith.addf %97, %96 : vector<16x32xf32>
    %99 = arith.divf %97, %98 : vector<16x32xf32>
    %100 = vector.extract_strided_slice %93 {offsets = [0, 32], sizes = [16, 32], strides = [1, 1]} : vector<16x128xf32> to vector<16x32xf32>
    %101 = arith.negf %100 : vector<16x32xf32>
    %102 = math.exp %101 : vector<16x32xf32>
    %cst_39 = arith.constant 1.000000e+00 : f32
    %103 = vector.broadcast %cst_39 : f32 to vector<16x32xf32>
    %104 = arith.addf %103, %102 : vector<16x32xf32>
    %105 = arith.divf %103, %104 : vector<16x32xf32>
    %106 = vector.extract_strided_slice %93 {offsets = [0, 64], sizes = [16, 32], strides = [1, 1]} : vector<16x128xf32> to vector<16x32xf32>
    %107 = vector.extract_strided_slice %93 {offsets = [0, 96], sizes = [16, 32], strides = [1, 1]} : vector<16x128xf32> to vector<16x32xf32>
    %108 = arith.mulf %99, %107 : vector<16x32xf32>
    %109 = arith.addf %106, %108 : vector<16x32xf32>
    %110 = math.tanh %109 : vector<16x32xf32>
    %cst_40 = arith.constant 1.000000e+00 : f32
    %111 = vector.broadcast %cst_40 : f32 to vector<16x32xf32>
    %112 = arith.subf %111, %105 : vector<16x32xf32>
    %113 = arith.mulf %112, %110 : vector<16x32xf32>
    %114 = arith.mulf %105, %87 : vector<16x32xf32>
    %115 = arith.addf %113, %114 : vector<16x32xf32>
    %cst_41 = arith.constant dense<0.000000e+00> : vector<16xf32>
    %116 = vector.multi_reduction <add>, %115, %cst_41 [1] : vector<16x32xf32> to vector<16xf32>
    %117 = vector.shape_cast %116 : vector<16xf32> to vector<16x1xf32>
    %cst_42 = arith.constant 3.200000e+01 : f32
    %118 = vector.broadcast %cst_42 : f32 to vector<16x1xf32>
    %119 = arith.divf %117, %118 : vector<16x1xf32>
    %120 = arith.mulf %115, %115 : vector<16x32xf32>
    %cst_43 = arith.constant dense<0.000000e+00> : vector<16xf32>
    %121 = vector.multi_reduction <add>, %120, %cst_43 [1] : vector<16x32xf32> to vector<16xf32>
    %122 = vector.shape_cast %121 : vector<16xf32> to vector<16x1xf32>
    %cst_44 = arith.constant 3.200000e+01 : f32
    %123 = vector.broadcast %cst_44 : f32 to vector<16x1xf32>
    %124 = arith.divf %122, %123 : vector<16x1xf32>
    %125 = arith.mulf %119, %119 : vector<16x1xf32>
    %126 = arith.subf %124, %125 : vector<16x1xf32>
    %127 = vector.broadcast %119 : vector<16x1xf32> to vector<16x32xf32>
    %128 = arith.subf %115, %127 : vector<16x32xf32>
    %cst_45 = arith.constant 9.99999974E-6 : f32
    %129 = vector.broadcast %cst_45 : f32 to vector<16x1xf32>
    %130 = arith.addf %126, %129 : vector<16x1xf32>
    %131 = math.rsqrt %130 : vector<16x1xf32>
    %132 = vector.broadcast %131 : vector<16x1xf32> to vector<16x32xf32>
    %133 = arith.mulf %128, %132 : vector<16x32xf32>
    %c8 = arith.constant 8 : index
    %c0_46 = arith.constant 0 : index
    %134 = vector.load %arg8[%c8, %c0_46] : memref<16x128xf32, #tpu.memory_space<vmem>>, vector<1x32xf32>
    %135 = vector.broadcast %134 : vector<1x32xf32> to vector<16x32xf32>
    %136 = arith.mulf %133, %135 : vector<16x32xf32>
    %c9 = arith.constant 9 : index
    %c0_47 = arith.constant 0 : index
    %137 = vector.load %arg8[%c9, %c0_47] : memref<16x128xf32, #tpu.memory_space<vmem>>, vector<1x32xf32>
    %138 = vector.broadcast %137 : vector<1x32xf32> to vector<16x32xf32>
    %139 = arith.addf %136, %138 : vector<16x32xf32>
    %c0_48 = arith.constant 0 : index
    %c0_49 = arith.constant 0 : index
    %140 = vector.load %arg7[%c0_48, %c0_49] : memref<32x6xf32, #tpu.memory_space<vmem>>, vector<32x6xf32>
    %cst_50 = arith.constant dense<0.000000e+00> : vector<16x6xf32>
    %141 = tpu.matmul %139, %140, %cst_50 {dimension_numbers = #tpu.dot_dimension_numbers<[1], [0], [0], [1], [0, 0, 1, 1], [], []>} : vector<16x32xf32>, vector<32x6xf32>, vector<16x6xf32> -> vector<16x6xf32>
    %c10 = arith.constant 10 : index
    %c0_51 = arith.constant 0 : index
    %142 = vector.load %arg8[%c10, %c0_51] : memref<16x128xf32, #tpu.memory_space<vmem>>, vector<1x6xf32>
    %143 = vector.broadcast %142 : vector<1x6xf32> to vector<16x6xf32>
    %144 = arith.addf %141, %143 : vector<16x6xf32>
    %c0_52 = arith.constant 0 : index
    %c0_53 = arith.constant 0 : index
    %145 = vector.load %arg3[%c0_52, %c0_53] : memref<16x6xf32, #tpu.memory_space<vmem>>, vector<16x6xf32>
    %cst_54 = arith.constant 0.000000e+00 : f32
    %146 = vector.broadcast %cst_54 : f32 to vector<16x6xf32>
    %147 = arith.cmpf ogt, %145, %146 : vector<16x6xf32>
    %cst_55 = arith.constant -1.000000e+10 : f32
    %148 = vector.broadcast %cst_55 : f32 to vector<16x6xf32>
    %149 = arith.select %147, %144, %148 : vector<16x6xi1>, vector<16x6xf32>
    %cst_56 = arith.constant dense<0xFF800000> : vector<16xf32>
    %150 = vector.multi_reduction <maximumf>, %149, %cst_56 [1] : vector<16x6xf32> to vector<16xf32>
    %151 = vector.shape_cast %150 : vector<16xf32> to vector<16x1xf32>
    %152 = vector.broadcast %151 : vector<16x1xf32> to vector<16x6xf32>
    %153 = arith.subf %149, %152 : vector<16x6xf32>
    %154 = math.exp %153 : vector<16x6xf32>
    %cst_57 = arith.constant dense<0.000000e+00> : vector<16xf32>
    %155 = vector.multi_reduction <add>, %154, %cst_57 [1] : vector<16x6xf32> to vector<16xf32>
    %156 = vector.shape_cast %155 : vector<16xf32> to vector<16x1xf32>
    %157 = math.log %156 : vector<16x1xf32>
    %158 = arith.addf %151, %157 : vector<16x1xf32>
    %159 = tpu.iota {dimensions = array<i32: 1>} : vector<16x6xi32>
    %160 = vector.broadcast %151 : vector<16x1xf32> to vector<16x6xf32>
    %161 = arith.cmpf oge, %149, %160 : vector<16x6xf32>
    %c6_i32 = arith.constant 6 : i32
    %162 = vector.broadcast %c6_i32 : i32 to vector<16x6xi32>
    %163 = arith.select %161, %159, %162 : vector<16x6xi1>, vector<16x6xi32>
    %cst_58 = arith.constant dense<2147483647> : vector<16xi32>
    %164 = vector.multi_reduction <minsi>, %163, %cst_58 [1] : vector<16x6xi32> to vector<16xi32>
    %165 = vector.shape_cast %164 : vector<16xi32> to vector<16x1xi32>
    %166 = vector.broadcast %165 : vector<16x1xi32> to vector<16x6xi32>
    %167 = arith.cmpi eq, %159, %166 : vector<16x6xi32>
    %168 = vector.broadcast %158 : vector<16x1xf32> to vector<16x6xf32>
    %169 = arith.subf %149, %168 : vector<16x6xf32>
    %cst_59 = arith.constant 0.000000e+00 : f32
    %170 = vector.broadcast %cst_59 : f32 to vector<16x6xf32>
    %171 = arith.select %167, %169, %170 : vector<16x6xi1>, vector<16x6xf32>
    %cst_60 = arith.constant dense<0.000000e+00> : vector<16xf32>
    %172 = vector.multi_reduction <add>, %171, %cst_60 [1] : vector<16x6xf32> to vector<16xf32>
    %173 = vector.shape_cast %172 : vector<16xf32> to vector<16x1xf32>
    %c0_61 = arith.constant 0 : index
    %c0_62 = arith.constant 0 : index
    %174 = vector.load %arg9[%c0_61, %c0_62] : memref<16x32xf32, #tpu.memory_space<vmem>>, vector<16x32xf32>
    tpu.vector_store %arg9[%c0_61, %c0_62], %115 {strides = array<i32>} : memref<16x32xf32, #tpu.memory_space<vmem>>, vector<16x32xf32>,
    %c0_63 = arith.constant 0 : index
    %c0_64 = arith.constant 0 : index
    %175 = vector.load %arg10[%c0_63, %c0_64] : memref<16x1xi32, #tpu.memory_space<vmem>>, vector<16x1xi32>
    tpu.vector_store %arg10[%c0_63, %c0_64], %165 {strides = array<i32>} : memref<16x1xi32, #tpu.memory_space<vmem>>, vector<16x1xi32>,
    %c0_65 = arith.constant 0 : index
    %c0_66 = arith.constant 0 : index
    %176 = vector.load %arg11[%c0_65, %c0_66] : memref<16x1xf32, #tpu.memory_space<vmem>>, vector<16x1xf32>
    tpu.vector_store %arg11[%c0_65, %c0_66], %173 {strides = array<i32>} : memref<16x1xf32, #tpu.memory_space<vmem>>, vector<16x1xf32>,
    return
  }
  func.func @transform_0(%arg0: i32) -> (i32, i32) {
    %c0_i32 = arith.constant 0 : i32
    %c0_i32_0 = arith.constant 0 : i32
    return %arg0, %c0_i32 : i32, i32
  }
  func.func @transform_1(%arg0: i32) -> (i32, i32) {
    %c0_i32 = arith.constant 0 : i32
    %c0_i32_0 = arith.constant 0 : i32
    return %arg0, %c0_i32 : i32, i32
  }
  func.func @transform_2(%arg0: i32) -> (i32, i32) {
    %c0_i32 = arith.constant 0 : i32
    %c0_i32_0 = arith.constant 0 : i32
    return %arg0, %c0_i32 : i32, i32
  }
  func.func @transform_3(%arg0: i32) -> (i32, i32) {
    %c0_i32 = arith.constant 0 : i32
    %c0_i32_0 = arith.constant 0 : i32
    %c0_i32_1 = arith.constant 0 : i32
    return %c0_i32, %c0_i32_0 : i32, i32
  }
  func.func @transform_4(%arg0: i32) -> (i32, i32) {
    %c0_i32 = arith.constant 0 : i32
    %c0_i32_0 = arith.constant 0 : i32
    %c0_i32_1 = arith.constant 0 : i32
    return %c0_i32, %c0_i32_0 : i32, i32
  }
  func.func @transform_5(%arg0: i32) -> (i32, i32) {
    %c0_i32 = arith.constant 0 : i32
    %c0_i32_0 = arith.constant 0 : i32
    %c0_i32_1 = arith.constant 0 : i32
    return %c0_i32, %c0_i32_0 : i32, i32
  }
  func.func @transform_6(%arg0: i32) -> (i32, i32) {
    %c0_i32 = arith.constant 0 : i32
    %c0_i32_0 = arith.constant 0 : i32
    %c0_i32_1 = arith.constant 0 : i32
    return %c0_i32, %c0_i32_0 : i32, i32
  }
  func.func @transform_7(%arg0: i32) -> (i32, i32) {
    %c0_i32 = arith.constant 0 : i32
    %c0_i32_0 = arith.constant 0 : i32
    %c0_i32_1 = arith.constant 0 : i32
    return %c0_i32, %c0_i32_0 : i32, i32
  }
  func.func @transform_8(%arg0: i32) -> (i32, i32) {
    %c0_i32 = arith.constant 0 : i32
    %c0_i32_0 = arith.constant 0 : i32
    return %arg0, %c0_i32 : i32, i32
  }
  func.func @transform_9(%arg0: i32) -> (i32, i32) {
    %c0_i32 = arith.constant 0 : i32
    %c0_i32_0 = arith.constant 0 : i32
    return %arg0, %c0_i32 : i32, i32
  }
  func.func @transform_10(%arg0: i32) -> (i32, i32) {
    %c0_i32 = arith.constant 0 : i32
    %c0_i32_0 = arith.constant 0 : i32
    return %arg0, %c0_i32 : i32, i32
  }
}

</mosaic_0001>

<bundles_post_ra>
// kernel: tpu_custom_call.1
= control target key start
LH: loop header
LB: loop body
LE: loop exit
PB: predicated region body
PF: predicated region fallthrough
CT: control target
= control target key end

     0   :  { %s2085_s0 = inlined_call_operand.vmem [shape: f32[32,16], index: 0, kind: input, shape index: {}]   ;;  %s2086_s1 = inlined_call_operand.vmem [shape: f32[32,32], index: 1, kind: input, shape index: {}]   ;;  %s2087_s2 = inlined_call_operand.vmem [shape: f32[32,6], index: 2, kind: input, shape index: {}]   ;;  %s2088_s3 = inlined_call_operand.hbm [shape: f32[16,32], index: 3, kind: input, shape index: {}]   ;;  %s2089_s4 = inlined_call_operand.vmem [shape: f32[32,32], index: 4, kind: input, shape index: {}]   ;;  %s2090_s5 = inlined_call_operand.vmem [shape: f32[64,128], index: 5, kind: input, shape index: {}]   ;;  %s2091_s6 = inlined_call_operand.vmem [shape: f32[32,6], index: 6, kind: input, shape index: {}]   ;;  %s2092_s7 = inlined_call_operand.vmem [shape: f32[16,128], index: 7, kind: input, shape index: {}]   ;;  %s2093_s8 = inlined_call_operand.hbm [shape: f32[32,32], index: 8, kind: output, shape index: {0}]   ;;  %s2094_s9 = inlined_call_operand.vmem [shape: s32[32,1], index: 9, kind: output, shape index: {1}]   ;;  %s2095_s10 = inlined_call_operand.vmem [shape: f32[32,1], index: 10, kind: output, shape index: {2}]  }
   0x1   :  { %2100 = sst [smem:[#allocation8_spill]] %s2085_s0 }
   0x2   :  { %16 = vsyncpa [#allocation3], 0 }
   0x3   :  { %17 = vsyncpa [#allocation4], 0 }
   0x4   :  { %19 = vsyncpa [#allocation4 + $0x1], 0  ;;  %s1760_s13 = smov 0   ;;  %s1762_s14 = smov 0  }
   0x5   :  { %s1764_s15 = smov 0   ;;  %s1766_s16 = smov 0  }
   0x6 LB: > { %s1781_s17 = sadd.s32 4294967295, %s1694_s16   ;;  %s1352_s18 = sadd.s32 4294967294, %s1694_s16   ;;  %s1694_s16 = sphi %s1766_s16, %s2115_s16   ;;  %s1690_s15 = sphi %s1764_s15, %s2114_s15   ;;  %s1686_s14 = sphi %s1762_s14, %s2113_s14   ;;  %s1682_s13 = sphi %s1760_s13, %s2112_s13  }
   0x7   : > { %s1785_s19 = sadd.s32 1, %s1694_s16   ;;  %s215_s20 = sadd.s32 1, %s1690_s15 }
   0x8   : > { %s212_s21 = ssub.s32 %s1694_s16, %s1785_s19  ;;  %p225_p0 = scmp.ne.s32.totalorder %s1690_s15, %s1686_s14 }
   0x9   : > { %p213_p1 = scmp.eq.s32.totalorder %s212_s21, 0  ;;  %p226_p2 = scmp.eq.s32.totalorder %s1781_s17, 1 }
   0xa   : > { %p231_p3 = scmp.ne.s32.totalorder %s1686_s14, %s1682_s13  ;;  %p232_p4 = scmp.eq.s32.totalorder %s1352_s18, 1 }
   0xb   : > { %s1796_s22 = scalar_select %p213_p1, %s1690_s15, %s215_s20  }
   0xc   : > { %p1798_p5 = por %p226_p2, %p225_p0  ;;  %p1802_p6 = por %p232_p4, %p231_p3 }
   0xd   : > { %p1353_p7 = scmp.ge.s32.totalorder %s1694_s16, 1  ;;  %p291_p8 = scmp.lt.s32.totalorder %s1694_s16, 3 }
   0xe   : > { %s2101_s23 = scalar_select %p1798_p5, 1, 0 }
   0xf   : > { %s2102_s24 = scalar_select %p1802_p6, 1, 0 }
  0x10   : > { %p2096_p9 = scmp.eq.s32.totalorder %s1781_s17, 0  ;;  %p1809_p10 = pnand %p1353_p7, %p291_p8 }
  0x11   : > { %s1696_s26 = smov [#allocation2]   ;;  %s1600_s11 = scalar_lea.hbm %s2088_s3, 256 }
  0x12   : > { %s2103_s25 = scalar_select %p1809_p10, 1, 0 }
  0x13   : > { %s303_s27 = sshll.u32 %s1696_s26, 4  ;;  %p1513_p11 = pneg %p1809_p10  ;;  %s304_s27 = int_to_ptr.vmem [resolvable:$true] %s303_s27 }
  0x14   : > { %p1601_p13 = scmp.ne.s32.totalorder %s2088_s3, %s1600_s11  ;;  %p1607_p3 = scmp.lt.u32.totalorder %s1600_s11, %s2088_s3 }
  0x15   : > { %p1817_p12 = pnand %p2096_p9, %p1513_p11 }
  0x17   : > { %p1602_p0 = pneg %p1817_p12 }
  0x19   : > { %p1603_p1 = pnand %p1602_p0, %p1601_p13 }
  0x1b   : > { %p1604_p2 = pneg %p1603_p1 }
  0x1d   : > { %p1609_p4 = pnand %p1607_p3, %p1604_p2 }
  0x1f   : > { %1612 = shalt.err (!%p1609_p4)
}
  0x20   : > { %s1613_s26 = scalar_lea.vmem %s304_s27, 256  ;;  %p1621_p9 = scmp.lt.s32.totalorder %s304_s27, %s304_s27 }
  0x21   : > { %p1614_p7 = scmp.ne.s32.totalorder %s304_s27, %s1613_s26  ;;  %p1622_p6 = scmp.lt.s32.totalorder %s1613_s26, %s1613_s26 }
  0x23   : > { %p1616_p8 = pnand %p1614_p7, %p1602_p0  ;;  %p1623_p5 = por %p1622_p6, %p1621_p9 }
  0x25   : > { %p1617_p11 = pneg %p1616_p8 }
  0x27   : > { %p1624_p10 = pnand %p1623_p5, %p1617_p11 }
  0x29   : > { %1627 = shalt.err (!%p1624_p10)
}
  0x2a   : > { %s1697_s29 = smov 128   ;;  %s1698_s30 = smov 8  }
  0x2b   : > { %1516 = dma.hbm_to_vmem [thread:$0]  (!%p1817_p12), %s2088_s3, 256, %s304_s27, [#allocation3], %s1697_s29, %s1697_s29, %s1698_s30  }
  0x2c   : > { %p2105_p13 = scmp.ne.s32.totalorder %s2103_s25, 0 }
  0x2d   : > { %p2106_p1 = scmp.eq.s32.totalorder (!%p2105_p13), %s1781_s17, 0 }
  0x2e   : > { %358 = sbr.rel (%p2105_p13) target bundleno = 2800 (0xaf0), region = 52 }
  0x35   : > { %1673 = dma.done.wait (%p2106_p1), [#allocation3], 256   ;;  %p2107_p0 = pmov %p2106_p1 }
  0x36   : > { %s1359_s11 = sshll.u32 %s1781_s17, 1  ;;  %vm449_vm0 = vcmask 130048   ;;  %s2108_s0 = sld [smem:[#allocation8_spill]]  ;;  %v495_v8 = vld [vmem:[#allocation2] sm:$0xff]  ;;  %v496_v9 = vld [vmem:[#allocation2 + $0x8] sm:$0xff]  ;;  %vm585_vm1 = vcmask 261120  }
  0x37   : > { %1675 = vsyncadd (%p2107_p0), [#allocation3], 4294967040  ;;  %p417_p5 = scmp.lt.s32.totalorder %s1359_s11, 3  ;;  %v1471_v10 = vpack.c.bf16 %v496_v9, %v495_v8  ;;  %v1369_v27 = vld [vmem:[%s2092_s7] ss:$0 sm:$0xff]  ;;  %v632_v51 = vld [vmem:[%s2089_s4 + $0x8] sm:$0xff] }
  0x38   : > { %v1370_v29 = vld [vmem:[%s2092_s7 + $0x1] ss:$0 sm:$0xff]  ;;  %v1371_v37 = vld [vmem:[%s2092_s7 + $0x2] ss:$0 sm:$0xff]  ;;  %v633_v52 = vld [vmem:[%s2089_s4 + $0x10] sm:$0xff]  ;;  %s1699_s30 = smov 32  }
  0x39   : > { %s2117_s11 = smov (!%p417_p5, %s1359_s11), 3  ;;  %1472 = vmatprep.subr.bf16.mxu0 %v1471_v10  ;;  %v631_v50 = vld [vmem:[%s2089_s4] sm:$0xff]  ;;  %v634_v54 = vld [vmem:[%s2089_s4 + $0x18] sm:$0xff]  ;;  %vm792_vm2 = vcmask 523264   ;;  %s1701_s28 = smov 96   ;;  %vm1092_vm5 = vcmask 48128  }
  0x3a   : > { %s1844_s20 = sshll.u32 %s2117_s11, 3  ;;  %1474 = vmatpush3.bf16.msra.mxu0 %v1471_v10  ;;  %v1475_v53 = vpack.c.bf16 %v632_v51, %v631_v50  ;;  %v1479_v55 = vpack.c.bf16 %v634_v54, %v633_v52  ;;  %v1374_v9 = vld [vmem:[%s2092_s7 + $0x3] ss:$0 sm:$0xff]  ;;  %s1700_s11 = smov 64   ;;  %vm1167_vm10 = vcmask 7168  }
  0x3b   : > { %s426_s29 = scalar_lea.vmem %s2086_s1, %s1844_s20  ;;  %s2099_s21 = sand.u32 1, %s1686_s14  }
  0x3c   : > { %s420_s27 = scalar_lea.vmem %s2108_s0, %s1844_s20  ;;  %1476 = vmatprep.subr.bf16.mxu1 %v1475_v53  ;;  %s432_s18 = scalar_lea.vmem %s2087_s2, %s1844_s20 }
  0x3d   : > { %v447_v0 = vld [vmem:[%s420_s27] sm:$0xff]  ;;  %v448_v1 = vld [vmem:[%s420_s27 + $0x8] sm:$0xff]  ;;  %1478 = vmatpush3.bf16.msra.mxu1 %v1475_v53  ;;  %s1358_s27 = sshll.u32 %s2099_s21, 4  ;;  %s439_s21 = scalar_lea.vmem %s2094_s9, %s1844_s20 }
  0x3e   : > { %v450_v2 = vsel %vm449_vm0, %v447_v0, 0.0  ;;  %v459_v3 = vmul.f32 %v447_v0, %v447_v0  ;;  %v460_v4 = vmul.f32 %v448_v1, %v448_v1  ;;  %v453_v6 = vsel %vm449_vm0, %v448_v1, 0.0  ;;  %1480 = vmatprep.subr.bf16.mxu1 %v1479_v55  ;;  %s1953_s0 = scalar_lea.vmem [#allocation5], %s1358_s27  ;;  %s1396_s26 = sshll.u32 %s1781_s17, 8 }
  0x3f   : > { %451 = vadd.xlane.f32.xlu0 %v450_v2  ;;  %s1196_s25 = sshll.u32 %s1953_s0, 4  ;;  %p2110_p9 = scmp.ne.s32.totalorder %s2101_s23, 0  ;;  %s2028_s25 = int_to_ptr.vmem [resolvable:$true] %s1196_s25 }
  0x40   : > { %v461_v5 = vsel %vm449_vm0, %v459_v3, 0.0  ;;  %v464_v7 = vsel %vm449_vm0, %v460_v4, 0.0 }
  0x41   : > { %462 = vadd.xlane.f32.xlu1 %v461_v5  ;;  %1482 = vmatpush3.bf16.msra.mxu1 %v1479_v55 }
  0x43   : > { %454 = vadd.xlane.f32.xlu0 %v453_v6 }
  0x45   : > { %465 = vadd.xlane.f32.xlu1 %v464_v7 }
  0xcc   : > { %v452_v11 = vpop.xlane.xlu0 %451 }
  0xcd   : > { %v457_v12 = vmul.f32 0.0625, %v452_v11 }
  0xce   : > { %v463_v13 = vpop.xlane.xlu1 %462 }
  0xcf   : > { %v469_v14 = vmul.f32 %v457_v12, %v457_v12  ;;  %v467_v15 = vmul.f32 0.0625, %v463_v13  ;;  %v473_v25 = vsub.f32 %v447_v0, %v457_v12 }
  0xd0   : > { %v455_v16 = vpop.xlane.xlu0 %454 }
  0xd1   : > { %v471_v17 = vsub.f32 %v467_v15, %v469_v14  ;;  %v458_v18 = vmul.f32 0.0625, %v455_v16  ;;  %v1375_v14 = vld [vmem:[%s2092_s7 + $0x4] ss:$0 sm:$0xff] }
  0xd2   : > { %v466_v19 = vpop.xlane.xlu1 %465 }
  0xd3   : > { %v475_v20 = vadd.f32 1e-05, %v471_v17  ;;  %v470_v21 = vmul.f32 %v458_v18, %v458_v18  ;;  %v468_v22 = vmul.f32 0.0625, %v466_v19  ;;  %v474_v30 = vsub.f32 %v448_v1, %v458_v18  ;;  %v1376_v18 = vld [vmem:[%s2092_s7 + $0x5] ss:$0 sm:$0xff] }
  0xd5   : > { %1564 = vrsqrt.f32 %v475_v20  ;;  %v472_v23 = vsub.f32 %v468_v22, %v470_v21 }
  0xd7   : > { %v476_v24 = vadd.f32 1e-05, %v472_v23 }
  0xd9   : > { %1566 = vrsqrt.f32 %v476_v24 }
  0xdf   : > { %v1565_v26 = vpop.eup %1564 }
  0xe0   : > { %v479_v28 = vmul.f32 %v1565_v26, %v473_v25 }
  0xe2   : > { %v486_v31 = vmul.f32 %v1369_v27, %v479_v28 }
  0xe3   : > { %v1567_v32 = vpop.eup %1566 }
  0xe4   : > { %v480_v33 = vmul.f32 %v1567_v32, %v474_v30  ;;  %v493_v34 = vadd.f32 %v1370_v29, %v486_v31  ;;  %v768_v31 = vld [vmem:[%s426_s29 + $0x8] sm:$0xff]  ;;  %v767_v32 = vld [vmem:[%s426_s29] sm:$0xff] }
  0xe6   : > { %v487_v35 = vmul.f32 %v1369_v27, %v480_v33  ;;  %1427 = vmatprep.mubr.msk.f32.mxu0 %vm449_vm0, %v493_v34  ;;  %v779_v33 = vld [vmem:[%s2090_s5] sm:$0xff]  ;;  %v780_v34 = vld [vmem:[%s2090_s5 + $0x8] sm:$0xff] }
  0xe8   : > { %v494_v36 = vadd.f32 %v1370_v29, %v487_v35  ;;  %v781_v35 = vld [vmem:[%s2090_s5 + $0x10] sm:$0xff] }
  0xea   : > { %1428 = vmatmul.mubr.msk.f32.vlgmr.msra.gmra.mrb[0].mxu0 %vm449_vm0, %v494_v36  ;;  %v1483_v36 = vpack.c.bf16 %v780_v34, %v779_v33 }
  0xec   : > { %1484 = vmatprep.subr.bf16.mxu0 %v1483_v36 }
  0xed   : > { %1486 = vmatpush3.bf16.msra.mxu0 %v1483_v36 }
 0x1bd   : > { %v1429_v38 = vpop.f32.mrb[0].mxu0 }
 0x1be   : > { %v580_v39 = vadd.f32 %v1429_v38, %v1371_v37  ;;  %v574_v40 = vpop.f32.mrb[1].mxu0 }
 0x1bf   : > { %v575_v41 = vadd.f32 %v1371_v37, %v574_v40  ;;  %v782_v37 = vld [vmem:[%s2090_s5 + $0x18] sm:$0xff]  ;;  %v784_v40 = vld [vmem:[%s2090_s5 + $0x28] sm:$0xff] }
 0x1c0   : > { %v584_v42 = vmax.f32 %v580_v39, 0.0  ;;  %v1487_v38 = vpack.c.bf16 %v782_v37, %v781_v35  ;;  %v783_v39 = vld [vmem:[%s2090_s5 + $0x20] sm:$0xff] }
 0x1c1   : > { %v583_v43 = vmax.f32 %v575_v41, 0.0  ;;  %v1491_v41 = vpack.c.bf16 %v784_v40, %v783_v39 }
 0x1c2   : > { %v589_v44 = vsel %vm585_vm1, %v584_v42, 0.0  ;;  %v596_v45 = vmul.f32 %v584_v42, %v584_v42  ;;  %1488 = vmatprep.subr.bf16.mxu0 %v1487_v38 }
 0x1c3   : > { %590 = vadd.xlane.f32.xlu1 %v589_v44  ;;  %v586_v46 = vsel %vm585_vm1, %v583_v43, 0.0  ;;  %v595_v47 = vmul.f32 %v583_v43, %v583_v43  ;;  %1490 = vmatpush3.bf16.msra.mxu0 %v1487_v38 }
 0x1c4   : > { %587 = vadd.xlane.f32.xlu0 %v586_v46  ;;  %v600_v48 = vsel %vm585_vm1, %v596_v45, 0.0  ;;  %1492 = vmatprep.subr.bf16.mxu0 %v1491_v41 }
 0x1c5   : > { %v597_v49 = vsel %vm585_vm1, %v595_v47, 0.0 }
 0x1c7   : > { %601 = vadd.xlane.f32.xlu1 %v600_v48  ;;  %1494 = vmatpush3.bf16.msra.mxu0 %v1491_v41 }
 0x1c8   : > { %598 = vadd.xlane.f32.xlu0 %v597_v49 }
 0x250   : > { %v591_v56 = vpop.xlane.xlu1 %590 }
 0x251   : > { %v594_v57 = vmul.f32 0.03125, %v591_v56  ;;  %v588_v58 = vpop.xlane.xlu0 %587 }
 0x252   : > { %v593_v59 = vmul.f32 0.03125, %v588_v58 }
 0x253   : > { %v606_v61 = vmul.f32 %v594_v57, %v594_v57  ;;  %v610_v6 = vsub.f32 %v584_v42, %v594_v57  ;;  %v785_v42 = vld [vmem:[%s2090_s5 + $0x30] sm:$0xff] }
 0x254   : > { %v602_v60 = vpop.xlane.xlu1 %601  ;;  %v605_v0 = vmul.f32 %v593_v59, %v593_v59  ;;  %v609_v8 = vsub.f32 %v583_v43, %v593_v59  ;;  %v786_v43 = vld [vmem:[%s2090_s5 + $0x38] sm:$0xff] }
 0x255   : > { %v604_v62 = vmul.f32 0.03125, %v602_v60  ;;  %v599_v63 = vpop.xlane.xlu0 %598  ;;  %v1495_v44 = vpack.c.bf16 %v786_v43, %v785_v42 }
 0x256   : > { %v603_v1 = vmul.f32 0.03125, %v599_v63 }
 0x257   : > { %v608_v2 = vsub.f32 %v604_v62, %v606_v61  ;;  %1496 = vmatprep.subr.bf16.mxu0 %v1495_v44  ;;  %v1379_v62 = vld [vmem:[%s2092_s7 + $0x6] ss:$0 sm:$0xff] }
 0x258   : > { %v607_v3 = vsub.f32 %v603_v1, %v605_v0  ;;  %1498 = vmatpush3.bf16.msra.mxu0 %v1495_v44  ;;  %v1380_v1 = vld [vmem:[%s2092_s7 + $0x7] ss:$0 sm:$0xff] }
 0x259   : > { %v612_v4 = vadd.f32 1e-05, %v608_v2 }
 0x25a   : > { %v611_v5 = vadd.f32 1e-05, %v607_v3 }
 0x25b   : > { %1568 = vrsqrt.f32 %v612_v4 }
 0x25c   : > { %1570 = vrsqrt.f32 %v611_v5 }
 0x265   : > { %v1569_v7 = vpop.eup %1568 }
 0x266   : > { %v1571_v10 = vpop.eup %1570  ;;  %v616_v11 = vmul.f32 %v1569_v7, %v610_v6 }
 0x267   : > { %v615_v12 = vmul.f32 %v1571_v10, %v609_v8 }
 0x268   : > { %v623_v13 = vmul.f32 %v1374_v9, %v616_v11  ;;  %v1381_v11 = vld [vmem:[%s2092_s7 + $0xb] ss:$0 sm:$0xff] }
 0x269   : > { %v622_v15 = vmul.f32 %v1374_v9, %v615_v12 }
 0x26a   : > { %v630_v17 = vadd.f32 %v1375_v14, %v623_v13 }
 0x26b   : > { %v629_v16 = vadd.f32 %v1375_v14, %v622_v15 }
 0x26d   : > { %1438 = vmatprep.mubr.msk.f32.mxu1 %vm585_vm1, %v629_v16 }
 0x26e   : > { %1439 = vmatmul.mubr.msk.f32.vlgmr.msra.gmra.mrb[0].mxu1 %vm585_vm1, %v630_v17 }
 0x341   : > { %v1440_v19 = vpop.f32.mrb[0].mxu1 }
 0x342   : > { %v718_v20 = vadd.f32 %v1440_v19, %v1376_v18  ;;  %v712_v21 = vpop.f32.mrb[1].mxu1 }
 0x343   : > { %v713_v22 = vadd.f32 %v1376_v18, %v712_v21 }
 0x344   : > { %v722_v23 = vmax.f32 %v718_v20, 0.0 }
 0x345   : > { %v721_v24 = vmax.f32 %v713_v22, 0.0 }
 0x346   : > { %v726_v25 = vsel %vm585_vm1, %v722_v23, 0.0  ;;  %v732_v26 = vmul.f32 %v722_v23, %v722_v23 }
 0x347   : > { %727 = vadd.xlane.f32.xlu1 %v726_v25  ;;  %v723_v27 = vsel %vm585_vm1, %v721_v24, 0.0  ;;  %v731_v28 = vmul.f32 %v721_v24, %v721_v24 }
 0x348   : > { %724 = vadd.xlane.f32.xlu0 %v723_v27  ;;  %v736_v29 = vsel %vm585_vm1, %v732_v26, 0.0 }
 0x349   : > { %v733_v30 = vsel %vm585_vm1, %v731_v28, 0.0 }
 0x34b   : > { %737 = vadd.xlane.f32.xlu1 %v736_v29 }
 0x34c   : > { %734 = vadd.xlane.f32.xlu0 %v733_v30 }
 0x35c   : > { %773 = vrot.lane.b32.xlu1 %v768_v31, %s1699_s30 }
 0x362   : > { %771 = vrot.lane.b32.xlu0 %v767_v32, %s1699_s30 }
 0x3d4   : > { %v728_v45 = vpop.xlane.xlu1 %727 }
 0x3d5   : > { %v730_v46 = vmul.f32 0.03125, %v728_v45  ;;  %v725_v47 = vpop.xlane.xlu0 %724 }
 0x3d6   : > { %v729_v48 = vmul.f32 0.03125, %v725_v47 }
 0x3d7   : > { %v742_v50 = vmul.f32 %v730_v46, %v730_v46  ;;  %v746_v59 = vsub.f32 %v722_v23, %v730_v46 }
 0x3d8   : > { %v738_v49 = vpop.xlane.xlu1 %737  ;;  %v741_v53 = vmul.f32 %v729_v48, %v729_v48  ;;  %v745_v61 = vsub.f32 %v721_v24, %v729_v48 }
 0x3d9   : > { %v740_v51 = vmul.f32 0.03125, %v738_v49  ;;  %v735_v52 = vpop.xlane.xlu0 %734 }
 0x3da   : > { %v739_v54 = vmul.f32 0.03125, %v735_v52 }
 0x3db   : > { %v744_v55 = vsub.f32 %v740_v51, %v742_v50 }
 0x3dc   : > { %v743_v56 = vsub.f32 %v739_v54, %v741_v53  ;;  %v774_v7 = vpop.permute.xlu1 %773  ;;  %v1387_v54 = vld [vmem:[%s2092_s7 + $0x9] ss:$0 sm:$0xff] }
 0x3dd   : > { %v748_v57 = vadd.f32 1e-05, %v744_v55  ;;  %v772_v6 = vpop.permute.xlu0 %771  ;;  %v1386_v55 = vld [vmem:[%s2092_s7 + $0x8] ss:$0 sm:$0xff] }
 0x3de   : > { %v747_v58 = vadd.f32 1e-05, %v743_v56  ;;  %v992_v56 = vld [vmem:[%s2091_s6] sm:$0xff] }
 0x3df   : > { %1572 = vrsqrt.f32 %v748_v57  ;;  %v993_v57 = vld [vmem:[%s2091_s6 + $0x8] sm:$0xff] }
 0x3e0   : > { %1574 = vrsqrt.f32 %v747_v58  ;;  %v1499_v58 = vpack.c.bf16 %v993_v57, %v992_v56 }
 0x3e2   : > { %1500 = vmatprep.subr.bf16.mxu1 %v1499_v58 }
 0x3e3   : > { %1502 = vmatpush3.bf16.msra.mxu1 %v1499_v58 }
 0x3e9   : > { %v1573_v60 = vpop.eup %1572 }
 0x3ea   : > { %v1575_v63 = vpop.eup %1574  ;;  %v752_v0 = vmul.f32 %v1573_v60, %v746_v59 }
 0x3eb   : > { %v751_v2 = vmul.f32 %v1575_v63, %v745_v61 }
 0x3ec   : > { %v759_v3 = vmul.f32 %v1379_v62, %v752_v0 }
 0x3ed   : > { %v758_v4 = vmul.f32 %v1379_v62, %v751_v2 }
 0x3ee   : > { %v766_v5 = vadd.f32 %v1380_v1, %v759_v3 }
 0x3ef   : > { %v765_v8 = vadd.f32 %v1380_v1, %v758_v4 }
 0x3f0   : > { %v778_v10 = vsel %vm585_vm1, %v766_v5, %v774_v7 }
 0x3f1   : > { %v777_v9 = vsel %vm585_vm1, %v765_v8, %v772_v6  ;;  %v994_v8 = vld [vmem:[%s2091_s6 + $0x10] sm:$0xff] }
 0x3f2   : > { %1457 = vmatprep.mubr.msk.f32.mxu0 %vm792_vm2, %v777_v9  ;;  %v995_v9 = vld [vmem:[%s2091_s6 + $0x18] sm:$0xff] }
 0x3f3   : > { %1458 = vmatmul.mubr.msk.f32.vlgmr.msra.gmra.mrb[2].mxu0 %vm792_vm2, %v778_v10 }
 0x4c6   : > { %v1459_v12 = vpop.f32.mrb[2].mxu0 }
 0x4c7   : > { %v865_v13 = vpop.f32.mrb[3].mxu0  ;;  %v871_v15 = vadd.f32 %v1459_v12, %v1381_v11 }
 0x4c8   : > { %v866_v14 = vadd.f32 %v1381_v11, %v865_v13  ;;  %v1503_v11 = vpack.c.bf16 %v995_v9, %v994_v8 }
 0x4c9   : > { %v1385_v17 = vmul.f32 -1.442695, %v871_v15 }
 0x4ca   : > { %888 = vrot.lane.b32.xlu1 %v866_v14, %s1699_s30  ;;  %v1384_v16 = vmul.f32 -1.442695, %v866_v14  ;;  %1504 = vmatprep.subr.bf16.mxu1 %v1503_v11 }
 0x4cb   : > { %1506 = vmatpush3.bf16.msra.mxu1 %v1503_v11 }
 0x4cc   : > { %1576 = vpow2.f32 %v1384_v16 }
 0x4cd   : > { %1578 = vpow2.f32 %v1385_v17 }
 0x4ce   : > { %890 = vrot.lane.b32.xlu1 %v871_v15, %s1699_s30 }
 0x4d6   : > { %v1577_v18 = vpop.eup %1576 }
 0x4d7   : > { %v880_v19 = vadd.f32 1.0, %v1577_v18  ;;  %v1579_v20 = vpop.eup %1578 }
 0x4d8   : > { %v881_v21 = vadd.f32 1.0, %v1579_v20 }
 0x4d9   : > { %1580 = vrcp.f32 %v880_v19 }
 0x4da   : > { %1582 = vrcp.f32 %v881_v21 }
 0x4e3   : > { %v1581_v22 = vpop.eup %1580 }
 0x4e4   : > { %v1583_v25 = vpop.eup %1582  ;;  %v908_v34 = vsub.f32 1.0, %v1581_v22  ;;  %v920_v36 = vmul.f32 %v1581_v22, %v772_v6 }
 0x4e5   : > { %v909_v39 = vsub.f32 1.0, %v1583_v25  ;;  %v921_v41 = vmul.f32 %v1583_v25, %v774_v7 }
 0x53c   : > { %v889_v23 = vpop.permute.xlu1 %888 }
 0x53d   : > { %v894_v24 = vmul.f32 %v1581_v22, %v889_v23 }
 0x53f   : > { %898 = vrot.lane.b32.xlu0 %v894_v24, %s1700_s11 }
 0x540   : > { %v891_v26 = vpop.permute.xlu1 %890 }
 0x541   : > { %v895_v27 = vmul.f32 %v1583_v25, %v891_v26  ;;  %v1087_v26 = vld [vmem:[%s432_s18 + $0x8] sm:$0xff] }
 0x542   : > { %vm1089_vm3 = vcmp.gt.f32.partialorder %v1087_v26, 0.0 }
 0x543   : > { %900 = vrot.lane.b32.xlu1 %v895_v27, %s1700_s11  ;;  %v1388_v27 = vld [vmem:[%s2092_s7 + $0xa] ss:$0 sm:$0xff]  ;;  %s2109_s11 = sand.u32 1, %s1686_s14  }
 0x544   : > { %s2038_s27 = scalar_lea.sflag [#allocation4], %s2109_s11 }
 0x5b1   : > { %v899_v28 = vpop.permute.xlu0 %898 }
 0x5b2   : > { %v904_v29 = vadd.f32 %v899_v28, %v866_v14  ;;  %v1086_v28 = vld [vmem:[%s432_s18] sm:$0xff]  ;;  %s2034_s18 = scalar_lea.hbm %s2093_s8, %s1396_s26 }
 0x5b3   : > { %vm1088_vm4 = vcmp.gt.f32.partialorder %v1086_v28, 0.0 }
 0x5b4   : > { %1584 = vtanh.f32 %v904_v29 }
 0x5b5   : > { %v901_v30 = vpop.permute.xlu1 %900 }
 0x5b6   : > { %v905_v31 = vadd.f32 %v901_v30, %v871_v15 }
 0x5b8   : > { %1586 = vtanh.f32 %v905_v31 }
 0x5be   : > { %v1585_v32 = vpop.eup %1584 }
 0x5bf   : > { %912 = vrot.lane.b32.xlu0 %v1585_v32, %s1701_s28 }
 0x5c2   : > { %v1587_v33 = vpop.eup %1586 }
 0x5c3   : > { %914 = vrot.lane.b32.xlu1 %v1587_v33, %s1701_s28 }
 0x631   : > { %v913_v35 = vpop.permute.xlu0 %912 }
 0x632   : > { %v918_v37 = vmul.f32 %v913_v35, %v908_v34 }
 0x634   : > { %v1941_v38 = vadd.f32 %v920_v36, %v918_v37  ;;  %v1117_v37 = vlaneseq }
 0x635   : > { %v915_v40 = vpop.permute.xlu1 %914 }
 0x636   : > { %v919_v42 = vmul.f32 %v915_v40, %v909_v39  ;;  %926 = vrot.lane.b32.xlu0 %v1941_v38, %s1701_s28  ;;  %v940_v44 = vmul.f32 %v1941_v38, %v1941_v38 }
 0x638   : > { %v923_v43 = vadd.f32 %v921_v41, %v919_v42 }
 0x63a   : > { %928 = vrot.lane.b32.xlu1 %v923_v43, %s1701_s28  ;;  %944 = vrot.lane.b32.xlu0 %v940_v44, %s1701_s28  ;;  %v941_v45 = vmul.f32 %v923_v43, %v923_v43 }
 0x63e   : > { %946 = vrot.lane.b32.xlu1 %v941_v45, %s1701_s28 }
 0x6a8   : > { %v927_v46 = vpop.permute.xlu0 %926 }
 0x6a9   : > { %1165 = vst.msk [vmem:[%s1953_s0] sm:$0xff] %vm585_vm1, %v927_v46  ;;  %v932_v47 = vsel %vm585_vm1, %v927_v46, 0.0 }
 0x6aa   : > { %933 = vadd.xlane.f32.xlu0 %v932_v47 }
 0x6ac   : > { %v929_v48 = vpop.permute.xlu1 %928  ;;  %v945_v49 = vpop.permute.xlu0 %944 }
 0x6ad   : > { %1166 = vst.msk [vmem:[%s1953_s0 + $0x8] sm:$0xff] %vm585_vm1, %v929_v48  ;;  %v935_v50 = vsel %vm585_vm1, %v929_v48, 0.0  ;;  %v950_v51 = vsel %vm585_vm1, %v945_v49, 0.0  ;;  %s1702_s0 = smov [#allocation5]  }
 0x6ae   : > { %936 = vadd.xlane.f32.xlu1 %v935_v50  ;;  %951 = vadd.xlane.f32.xlu0 %v950_v51 }
 0x6b0   : > { %v947_v52 = vpop.permute.xlu1 %946 }
 0x6b1   : > { %v953_v53 = vsel %vm585_vm1, %v947_v52, 0.0 }
 0x6b2   : > { %954 = vadd.xlane.f32.xlu0 %v953_v53 }
 0x6bf   : > { %987 = vrot.lane.b32.xlu1 %v1387_v54, %s1699_s30 }
 0x6c8   : > { %976 = vrot.lane.b32.xlu0 %v1386_v55, %s1699_s30  ;;  %s1632_s30 = sshll.u32 %s1702_s0, 4  ;;  %s1633_s30 = int_to_ptr.vmem [resolvable:$false] %s1632_s30 }
 0x6c9   : > { %p1635_p2 = scmp.lt.s32.totalorder %s2028_s25, %s1633_s30 }
 0x737   : > { %v934_v59 = vpop.xlane.xlu0 %933 }
 0x738   : > { %v938_v60 = vmul.f32 0.03125, %v934_v59 }
 0x73a   : > { %v958_v63 = vmul.f32 %v938_v60, %v938_v60  ;;  %v962_v12 = vsub.f32 %v1941_v38, %v938_v60  ;;  %v2003_v38 = vand.u32 127, %v1117_v37 }
 0x73b   : > { %v937_v61 = vpop.xlane.xlu1 %936  ;;  %v952_v62 = vpop.xlane.xlu0 %951 }
 0x73c   : > { %v939_v0 = vmul.f32 0.03125, %v937_v61  ;;  %v956_v1 = vmul.f32 0.03125, %v952_v62 }
 0x73e   : > { %v960_v2 = vsub.f32 %v956_v1, %v958_v63  ;;  %v959_v4 = vmul.f32 %v939_v0, %v939_v0  ;;  %v963_v17 = vsub.f32 %v923_v43, %v939_v0 }
 0x73f   : > { %v955_v3 = vpop.xlane.xlu0 %954  ;;  %v988_v16 = vpop.permute.xlu1 %987 }
 0x740   : > { %v964_v5 = vadd.f32 1e-05, %v960_v2  ;;  %v957_v6 = vmul.f32 0.03125, %v955_v3 }
 0x742   : > { %1588 = vrsqrt.f32 %v964_v5  ;;  %v961_v7 = vsub.f32 %v957_v6, %v959_v4 }
 0x743   : > { %v977_v14 = vpop.permute.xlu0 %976 }
 0x744   : > { %v965_v10 = vadd.f32 1e-05, %v961_v7 }
 0x746   : > { %1590 = vrsqrt.f32 %v965_v10 }
 0x74c   : > { %v1589_v13 = vpop.eup %1588 }
 0x74d   : > { %v968_v15 = vmul.f32 %v1589_v13, %v962_v12 }
 0x74f   : > { %v979_v18 = vmul.f32 %v977_v14, %v968_v15 }
 0x750   : > { %v1591_v19 = vpop.eup %1590 }
 0x751   : > { %v969_v20 = vmul.f32 %v1591_v19, %v963_v17  ;;  %v990_v21 = vadd.f32 %v988_v16, %v979_v18 }
 0x753   : > { %v980_v22 = vmul.f32 %v977_v14, %v969_v20  ;;  %1003 = vrot.lane.b32.xlu1 %v990_v21, %s1701_s28 }
 0x755   : > { %v991_v23 = vadd.f32 %v988_v16, %v980_v22 }
 0x757   : > { %1005 = vrot.lane.b32.xlu1 %v991_v23, %s1701_s28  ;;  %s1628_s28 = scalar_lea.vmem %s2028_s25, 256 }
 0x758   : > { %p1629_p6 = scmp.ne.s32.totalorder %s2028_s25, %s1628_s28 }
 0x75a   : > { %p1630_p10 = pnand %p1629_p6, %p2110_p9 }
 0x75c   : > { %p1631_p12 = pneg %p1630_p10 }
 0x7c5   : > { %v1004_v24 = vpop.permute.xlu1 %1003 }
 0x7c6   : > { %1468 = vmatprep.mubr.msk.f32.mxu1 %vm585_vm1, %v1004_v24 }
 0x7c9   : > { %v1006_v25 = vpop.permute.xlu1 %1005 }
 0x7ca   : > { %1469 = vmatmul.mubr.msk.f32.vlgmr.msra.gmra.mrb[2].mxu1 %vm585_vm1, %v1006_v25 }
 0x89d   : > { %v1470_v29 = vpop.f32.mrb[2].mxu1 }
 0x89e   : > { %v1083_v30 = vadd.f32 %v1470_v29, %v1388_v27  ;;  %v1077_v31 = vpop.f32.mrb[3].mxu1 }
 0x89f   : > { %v1078_v32 = vadd.f32 %v1388_v27, %v1077_v31 }
 0x8a0   : > { %v1995_v33 = vsel %vm1089_vm3, %v1083_v30, -1e+10 }
 0x8a1   : > { %v1997_v34 = vsel %vm1088_vm4, %v1078_v32, -1e+10  ;;  %v1096_v35 = vsel %vm1092_vm5, %v1995_v33, -inf }
 0x8a2   : > { %1097 = vmax.xlane.f32.xlu1 %v1096_v35  ;;  %v1093_v36 = vsel %vm1092_vm5, %v1997_v34, -inf }
 0x8a3   : > { %1094 = vmax.xlane.f32.xlu0 %v1093_v36 }
 0x92f   : > { %v1098_v39 = vpop.xlane.xlu1 %1097 }
 0x930   : > { %v1100_v40 = vsub.f32 %v1995_v33, %v1098_v39  ;;  %vm1120_vm6 = vcmp.ge.f32.partialorder %v1995_v33, %v1098_v39  ;;  %v1095_v41 = vpop.xlane.xlu0 %1094 }
 0x931   : > { %v1099_v42 = vsub.f32 %v1997_v34, %v1095_v41  ;;  %vm1119_vm7 = vcmp.ge.f32.partialorder %v1997_v34, %v1095_v41  ;;  %v1122_v43 = vsel %vm1120_vm6, %v2003_v38, 6 }
 0x932   : > { %v1103_v44 = vmul.f32 1.442695, %v1100_v40  ;;  %v1121_v45 = vsel %vm1119_vm7, %v2003_v38, 6  ;;  %v1138_v48 = vsel %vm1092_vm5, %v1122_v43, 2147483647 }
 0x933   : > { %v1101_v46 = vmul.f32 1.442695, %v1099_v42  ;;  %v1123_v47 = vsel %vm1092_vm5, %v1121_v45, 2147483647  ;;  %v1140_v51 = vshra.s32 %v1138_v48, 16  ;;  %v1139_v60 = vand.u32 65535, %v1138_v48 }
 0x934   : > { %1592 = vpow2.f32 %v1103_v44  ;;  %v1125_v49 = vshra.s32 %v1123_v47, 16  ;;  %v1124_v57 = vand.u32 65535, %v1123_v47 }
 0x935   : > { %1594 = vpow2.f32 %v1101_v46  ;;  %v1142_v52 = vcvt.s32.f32 %v1140_v51  ;;  %v1141_v63 = vcvt.s32.f32 %v1139_v60 }
 0x936   : > { %v1127_v50 = vcvt.s32.f32 %v1125_v49  ;;  %v1126_v59 = vcvt.s32.f32 %v1124_v57 }
 0x938   : > { %1128 = vmin.xlane.f32.xlu0 %v1127_v50 }
 0x93c   : > { %1143 = vmin.xlane.f32.xlu0 %v1142_v52 }
 0x93e   : > { %v1593_v53 = vpop.eup %1592 }
 0x93f   : > { %v1595_v54 = vpop.eup %1594  ;;  %v1108_v55 = vsel %vm1092_vm5, %v1593_v53, 0.0 }
 0x940   : > { %1109 = vadd.xlane.f32.xlu1 %v1108_v55  ;;  %v1105_v56 = vsel %vm1092_vm5, %v1595_v54, 0.0 }
 0x941   : > { %1106 = vadd.xlane.f32.xlu0 %v1105_v56 }
 0x9c5   : > { %v1129_v58 = vpop.xlane.xlu0 %1128 }
 0x9c6   : > { %vm1130_vm8 = vcmp.eq.f32.partialorder %v1127_v50, %v1129_v58  ;;  %v1135_v6 = vcvt.f32.s32 %v1129_v58 }
 0x9c7   : > { %v1131_v61 = vsel %vm1130_vm8, %v1126_v59, inf }
 0x9c8   : > { %1132 = vmin.xlane.f32.xlu0 %v1131_v61  ;;  %v1136_v10 = vshll.u32 %v1135_v6, 16 }
 0x9c9   : > { %v1144_v62 = vpop.xlane.xlu0 %1143 }
 0x9ca   : > { %vm1145_vm9 = vcmp.eq.f32.partialorder %v1142_v52, %v1144_v62  ;;  %v1150_v11 = vcvt.f32.s32 %v1144_v62 }
 0x9cb   : > { %v1146_v0 = vsel %vm1145_vm9, %v1141_v63, inf }
 0x9cc   : > { %1147 = vmin.xlane.f32.xlu1 %v1146_v0  ;;  %v1151_v17 = vshll.u32 %v1150_v11, 16 }
 0x9cd   : > { %v1110_v2 = vpop.xlane.xlu1 %1109 }
 0x9ce   : > { %v1107_v1 = vpop.xlane.xlu0 %1106 }
 0x9cf   : > { %1596 = vlog2.f32 %v1107_v1 }
 0x9d0   : > { %1598 = vlog2.f32 %v1110_v2 }
 0x9d9   : > { %v1597_v3 = vpop.eup %1596 }
 0x9da   : > { %v1112_v4 = vmul.f32 0.6931472, %v1597_v3  ;;  %v1599_v5 = vpop.eup %1598 }
 0x9db   : > { %v1114_v7 = vmul.f32 0.6931472, %v1599_v5 }
 0x9dc   : > { %v1115_v8 = vadd.f32 %v1112_v4, %v1095_v41 }
 0x9dd   : > { %v1116_v14 = vadd.f32 %v1114_v7, %v1098_v39 }
 0x9de   : > { %v1155_v16 = vsub.f32 %v1997_v34, %v1115_v8 }
 0x9df   : > { %v1156_v22 = vsub.f32 %v1995_v33, %v1116_v14 }
 0xa55   : > { %v1133_v9 = vpop.xlane.xlu0 %1132 }
 0xa56   : > { %v1134_v12 = vcvt.f32.s32 %v1133_v9 }
 0xa58   : > { %v1137_v13 = vadd.s32 %v1136_v10, %v1134_v12 }
 0xa59   : > { %v1148_v15 = vpop.xlane.xlu1 %1147 }
 0xa5a   : > { %v1149_v18 = vcvt.f32.s32 %v1148_v15  ;;  %vm1153_vm11 = vcmp.eq.s32.totalorder %v2003_v38, %v1137_v13  ;;  %1168 = vst.msk [vmem:[%s439_s21] sm:$0xff] %vm1167_vm10, %v1137_v13 }
 0xa5b   : > { %v1157_v19 = vsel %vm1153_vm11, %v1155_v16, 0.0 }
 0xa5c   : > { %v1152_v20 = vadd.s32 %v1151_v17, %v1149_v18  ;;  %v1159_v21 = vsel %vm1092_vm5, %v1157_v19, 0.0 }
 0xa5d   : > { %1160 = vadd.xlane.f32.xlu0 %v1159_v21 }
 0xa5e   : > { %vm1154_vm12 = vcmp.eq.s32.totalorder %v2003_v38, %v1152_v20  ;;  %1169 = vst.msk [vmem:[%s439_s21 + $0x8] sm:$0xff] %vm1167_vm10, %v1152_v20  ;;  %s1634_s21 = scalar_lea.vmem %s1633_s30, 512 }
 0xa5f   : > { %v1158_v23 = vsel %vm1154_vm12, %v1156_v22, 0.0  ;;  %p1636_p3 = scmp.lt.s32.totalorder %s1634_s21, %s1628_s28 }
 0xa60   : > { %v1162_v24 = vsel %vm1092_vm5, %v1158_v23, 0.0 }
 0xa61   : > { %1163 = vadd.xlane.f32.xlu1 %v1162_v24  ;;  %p1637_p4 = por %p1636_p3, %p1635_p2 }
 0xa63   : > { %p1638_p7 = pnand %p1637_p4, %p1631_p12 }
 0xa65   : > { %1641 = shalt.err (!%p1638_p7)
}
 0xa66   : > { %s1642_s17 = scalar_lea.hbm %s2034_s18, 256  ;;  %s1646_s12 = scalar_lea.hbm %s2093_s8, 512 }
 0xa67   : > { %p1643_p8 = scmp.ne.s32.totalorder %s2034_s18, %s1642_s17  ;;  %p1647_p1 = scmp.lt.u32.totalorder %s2034_s18, %s2093_s8 }
 0xa68   : > { %p1648_p0 = scmp.lt.u32.totalorder %s1646_s12, %s1642_s17  ;;  %p1650_p6 = scmp.lt.u32.totalorder %s1642_s17, %s2034_s18 }
 0xa69   : > { %p1644_p11 = pnand %p1643_p8, %p2110_p9 }
 0xa6a   : > { %p1649_p5 = por %p1648_p0, %p1647_p1 }
 0xa6b   : > { %p1645_p13 = pneg %p1644_p11 }
 0xa6c   : > { %p1651_p10 = por %p1650_p6, %p1649_p5 }
 0xa6e   : > { %p1652_p12 = pnand %p1651_p10, %p1645_p13 }
 0xa70   : > { %1655 = shalt.err (!%p1652_p12)
}
 0xa71   : > { %s1703_s28 = smov 128   ;;  %s1704_s30 = smov 8  }
 0xa72   : > { %1511 = dma.vmem_to_hbm [thread:$0]  (%p2110_p9), %s2028_s25, 256, %s2034_s18, %s2038_s27, %s1703_s28, %s1703_s28, %s1704_s30  }
 0xa73   : > { %s445_s29 = scalar_lea.vmem %s2095_s10, %s1844_s20 }
 0xaea   : > { %v1161_v25 = vpop.xlane.xlu0 %1160 }
 0xaeb   : > { %1170 = vst.msk [vmem:[%s445_s29] sm:$0xff] %vm1167_vm10, %v1161_v25 }
 0xaee   : > { %v1164_v26 = vpop.xlane.xlu1 %1163 }
 0xaef   : > { %1171 = vst.msk [vmem:[%s445_s29 + $0x8] sm:$0xff] %vm1167_vm10, %v1164_v26 }
 0xaf0 PF: > { %p1523_p2 = scmp.ge.s32.totalorder %s1694_s16, 2  ;;  %s1219_s17 = sand.u32 1, %s1682_s13  }
 0xaf1   : > { %p2111_p3 = scmp.ne.s32.totalorder %s2102_s24, 0  ;;  %s1220_s23 = scalar_lea.sflag [#allocation4], %s1219_s17 }
 0xaf3   : > { %p1518_p4 = pnand %p1523_p2, %p2111_p3 }
 0xaf5   : > { %1677 = dma.done.wait (!%p1518_p4), %s1220_s23, 256  }
 0xaf6   : > { %1679 = vsyncadd (!%p1518_p4), %s1220_s23, 4294967040  ;;  %p22_p9 = scmp.ge.s32.totalorder %s1785_s19, 4   ;;  %s2112_s13 = smov %s1686_s14 }
 0xaf7   : > { %s2113_s14 = smov %s1690_s15  ;;  %s2114_s15 = smov %s1796_s22 }
 0xaf8   : > { %s2115_s16 = smov %s1785_s19  ;;  %24 = sbr.rel (!%p22_p9) target bundleno = 6 (0x6), region = 122 }
 0xaff   :  { %1241 = vsyncpa [#allocation3], 1 }
 0xb00   :  { %1243 = vsyncpa [#allocation3 + $0x1], 1 }
 0xb01   :  { %1244 = vsyncpa [#allocation4], 1 }
 0xb02   :  { %1246 = vsyncpa [#allocation4 + $0x1], 1 }

</bundles_post_ra>
